<compile_context>
chip_gen: v5e
topology: v5e:2x2
jax: 0.10.0
libtpu: 0.0.40
codegen_flags: <defaults>
</compile_context>

<pallas_src>
import jax
import jax.numpy as jnp
from jax.experimental import pallas as pl
from jax.experimental.pallas import tpu as pltpu


def _round_up(x, m):
    return (x + m - 1) // m * m


def _lane_multiple(d_in, hid_f, out_f, cd_bytes):
    """128 is always correct; prefer 256 on v6e/v7x (2x256^2 MXU) when the
    extra zero-padded weight columns stay cheap. Falls back to 128."""
    try:
        kind = jax.devices()[0].device_kind.lower()
    except Exception:
        return 128
    if not any(g in kind for g in ("v6", "v7")):
        return 128  # v5e MXU is 4x128^2 -> 128 alignment already optimal
    hp, op = _round_up(hid_f, 256), _round_up(out_f, 256)
    if (d_in * hp + hp * op) * cd_bytes <= (8 << 20):
        return 256
    return 128


def pack_multihead_params(w1, b1, w2, b2, *, compute_dtype=jnp.bfloat16,
                          lane_multiple=None):
    """One-time packing of per-head weights into fused, lane-dense layouts.

    Call at model-load time (NOT inside the per-step forward) and pass the
    result to multi_head_regressor_packed().

    w1: (NH, D_in, H)   b1: (NH, 1, H)
    w2: (NH, H, O_h)    b2: (NH, 1, O_h)
    """
    NH, D_in, H = w1.shape
    O_h = w2.shape[-1]
    HF, NO = NH * H, NH * O_h
    cd = jnp.dtype(compute_dtype)
    if lane_multiple is None:
        lane_multiple = _lane_multiple(D_in, HF, NO, cd.itemsize)
    HFp, NOp = _round_up(HF, lane_multiple), _round_up(NO, lane_multiple)

    # Layer 1 fused over heads: W1f[:, n*H:(n+1)*H] = w1[n]; zero-pad lanes.
    w1f = jnp.transpose(w1, (1, 0, 2)).reshape(D_in, HF)
    w1f = jnp.pad(w1f, ((0, 0), (0, HFp - HF))).astype(cd)
    b1f = jnp.pad(b1.reshape(1, HF), ((0, 0), (0, HFp - HF))).astype(jnp.float32)

    # Layer 2 block-diagonal: y[:, n*O_h:(n+1)*O_h] = h[:, n*H:(n+1)*H] @ w2[n].
    # TODO(synk): block-diag wastes O(NH) MXU FLOPs and NH^2*H*O_h weight bytes;
    # switch to a head-blocked grid / per-head static loop once NH grows past ~8.
    eye = jnp.eye(NH, dtype=w2.dtype)
    w2bd = jnp.einsum('nho,nm->nhmo', w2, eye).reshape(HF, NO)
    w2bd = jnp.pad(w2bd, ((0, HFp - HF), (0, NOp - NO))).astype(cd)
    b2f = jnp.pad(b2.reshape(1, NO), ((0, 0), (0, NOp - NO))).astype(jnp.float32)

    return {"w1f": w1f, "b1f": b1f, "w2bd": w2bd, "b2f": b2f,
            "out_features": NO}


def _fused_heads_kernel(x_ref, w1_ref, b1_ref, w2_ref, b2_ref, out_ref):
    """One batch tile; all heads fused.

    Layer 1: (tb, D_in) @ (D_in, HFp)  -> hidden for all heads at once.
    Layer 2: (tb, HFp)  @ (HFp, NOp)   -> block-diagonal; concatenated layout.
    Matmul operands may be bf16; accumulation and bias/ReLU epilogue are f32.
    """
    h = jnp.dot(x_ref[...], w1_ref[...], preferred_element_type=jnp.float32)
    h = jnp.maximum(h + b1_ref[...], 0.0)                   # f32 epilogue (VPU)
    y = jnp.dot(h.astype(w2_ref.dtype), w2_ref[...],
                preferred_element_type=jnp.float32)
    out_ref[...] = (y + b2_ref[...]).astype(out_ref.dtype)


def multi_head_regressor_packed(x, packed, *, max_tile_b=512,
                                single_buffer_weights=True,
                                vmem_budget_bytes=40 << 20):
    """MultiHeadRegressor forward (Concatenate mode) with pre-packed weights.

    x: (B, D_in). Returns (B, NH*O_h) == torch.cat([head_n(x)], dim=1).
    """
    B, D_in = x.shape
    w1f, b1f, w2bd, b2f = packed["w1f"], packed["b1f"], packed["w2bd"], packed["b2f"]
    NO = packed["out_features"]
    HFp, NOp = w1f.shape[1], w2bd.shape[1]
    cd = w1f.dtype
    out_dtype = x.dtype
    cd_b = jnp.dtype(cd).itemsize
    out_b = jnp.dtype(out_dtype).itemsize
    # TODO(synk): optionally zero-pad D_in to 128 for lane-dense X loads; skipped
    # here to avoid rewriting X through HBM (modest win only).
    x_c = x.astype(cd)

    n_wbuf = 1 if single_buffer_weights else 2
    w_bytes = n_wbuf * ((D_in * HFp + HFp * NOp) * cd_b + (HFp + NOp) * 4)

    def vmem_need(tb):
        return (w_bytes
                + 2 * tb * D_in * cd_b            # X tile (double-buffered)
                + 2 * tb * NOp * out_b            # out tile (double-buffered)
                + tb * HFp * 4 + tb * NOp * 4)    # f32 intermediates h, y

    # Batch tile: multiple of 8 sublanes; prefer >= 2 parallel grid steps when
    # the batch allows (v7x megacore); shrink until it fits the VMEM budget
    # (re-derived so a v6e-comfortable tile cannot OOM v7x's 64 MiB VMEM).
    tile_b = min(max_tile_b, _round_up(B, 8))
    if B > 8 and pl.cdiv(B, tile_b) < 2:
        tile_b = _round_up(pl.cdiv(B, 2), 8)
    while tile_b > 8 and vmem_need(tile_b) > vmem_budget_bytes:
        tile_b = max(8, _round_up(tile_b // 2, 8))

    grid_b = pl.cdiv(B, tile_b)       # no jnp.pad of X: boundary block is masked
    vmem_limit = int(min(vmem_need(tile_b) + (16 << 20), 64 << 20))

    cost = pl.CostEstimate(
        flops=2 * B * (D_in * HFp + HFp * NOp),
        transcendentals=0,
        bytes_accessed=(B * D_in * cd_b + B * NOp * out_b
                        + (D_in * HFp + HFp * NOp) * cd_b + (HFp + NOp) * 4))

    def build_and_run(weight_pipeline_mode):
        def w_spec(shape):
            if weight_pipeline_mode is None:
                return pl.BlockSpec(shape, lambda i: (0, 0))
            return pl.BlockSpec(shape, lambda i: (0, 0),
                                pipeline_mode=weight_pipeline_mode)
        return pl.pallas_call(
            _fused_heads_kernel,
            out_shape=jax.ShapeDtypeStruct((B, NOp), out_dtype),
            grid_spec=pl.GridSpec(
                grid=(grid_b,),
                in_specs=[
                    pl.BlockSpec((tile_b, D_in), lambda i: (i, 0)),  # X tile
                    w_spec((D_in, HFp)),                             # W1 fused (resident)
                    w_spec((1, HFp)),                                # b1 fused (resident)
                    w_spec((HFp, NOp)),                              # W2 block-diag (resident)
                    w_spec((1, NOp)),                                # b2 fused (resident)
                ],
                out_specs=pl.BlockSpec((tile_b, NOp), lambda i: (i, 0)),
            ),
            compiler_params=pltpu.CompilerParams(
                dimension_semantics=("parallel",),
                vmem_limit_bytes=vmem_limit),
            cost_estimate=cost,
        )(x_c, w1f, b1f, w2bd, b2f)

    if single_buffer_weights:
        try:
            out = build_and_run(pl.Buffered(1))   # resident weights: no double buffer
        except Exception:
            out = build_and_run(None)             # fallback: default buffering
    else:
        out = build_and_run(None)

    return out[:, :NO] if NOp != NO else out


def multi_head_regressor(x, w1, b1, w2, b2, *, compute_dtype=jnp.bfloat16,
                         max_tile_b=512):
    """Convenience wrapper: pack + forward. For repeated calls, pack once with
    pack_multihead_params() and call multi_head_regressor_packed()."""
    packed = pack_multihead_params(w1, b1, w2, b2, compute_dtype=compute_dtype)
    return multi_head_regressor_packed(x, packed, max_tile_b=max_tile_b)


def _reference(x, w1, b1, w2, b2):
    preds = []
    for h in range(w1.shape[0]):
        hid = jnp.maximum(x @ w1[h] + b1[h], 0.0)
        preds.append(hid @ w2[h] + b2[h])
    return jnp.concatenate(preds, axis=1)


if __name__ == "__main__":
    # Small, module-consistent shapes (B % 8 != 0 to exercise boundary masking).
    B, D_in, H, O_h, NH = 2, 32, 32, 16, 4

    key = jax.random.PRNGKey(0)
    kx, k1, k2, k3, k4 = jax.random.split(key, 5)

    x = jax.random.normal(kx, (B, D_in), dtype=jnp.float32)
    w1 = 0.1 * jax.random.normal(k1, (NH, D_in, H), dtype=jnp.float32)
    b1 = 0.1 * jax.random.normal(k2, (NH, 1, H), dtype=jnp.float32)
    w2 = 0.1 * jax.random.normal(k3, (NH, H, O_h), dtype=jnp.float32)
    b2 = 0.1 * jax.random.normal(k4, (NH, 1, O_h), dtype=jnp.float32)

    y_ref = _reference(x, w1, b1, w2, b2)

    # Strict f32 check (compute_dtype override).
    packed_f32 = pack_multihead_params(w1, b1, w2, b2, compute_dtype=jnp.float32)
    y_f32 = multi_head_regressor_packed(x, packed_f32)
    jax.block_until_ready(y_f32)
    assert y_f32.shape == (B, NH * O_h)
    assert jnp.allclose(y_f32, y_ref, atol=1e-5, rtol=1e-5)

    # Default perf path: bf16 matmul operands (X and weights quantized to bf16),
    # f32 accumulate + f32 epilogue. Pack once (model-load time), reuse forward.
    packed_bf16 = pack_multihead_params(w1, b1, w2, b2)
    y_bf16 = multi_head_regressor_packed(x, packed_bf16)
    jax.block_until_ready(y_bf16)
    assert y_bf16.shape == (B, NH * O_h)
    assert jnp.allclose(y_bf16, y_ref, atol=5e-2, rtol=5e-2)

    # TODO(synk): enumMultiHeadOutMode.Append returns a Python list of per-head
    # arrays (no single-tensor equivalent); Sum/Average raise NotImplementedError
    # in the original module. Only Concatenate is kernelized here; heterogeneous
    # head modules (different widths/architectures) are not supported.
    print("KERNEL_OK")
</pallas_src>

<mosaic_0001>
module attributes {stable_mosaic.version = 11 : i64} {
  func.func @_fused_heads_kernel(%arg0: i32, %arg1: memref<8x32xf32, #tpu.memory_space<vmem>>, %arg2: memref<32x128xf32, #tpu.memory_space<vmem>>, %arg3: memref<1x128xf32, #tpu.memory_space<vmem>>, %arg4: memref<128x128xf32, #tpu.memory_space<vmem>>, %arg5: memref<1x128xf32, #tpu.memory_space<vmem>>, %arg6: memref<8x128xf32, #tpu.memory_space<vmem>>) attributes {dimension_semantics = [#tpu.dimension_semantics<parallel>], iteration_bounds = array<i64: 1>, scalar_prefetch = 0 : i64, scratch_operands = 0 : i64, tpu.core_type = #tpu.core_type<tc>, window_params = [{transform_indices = @transform_0, window_bounds = array<i64: 8, 32>}, {pipeline_mode = #tpu.pipeline_mode<synchronous>, transform_indices = @transform_1, window_bounds = array<i64: 32, 128>}, {pipeline_mode = #tpu.pipeline_mode<synchronous>, transform_indices = @transform_2, window_bounds = array<i64: 1, 128>}, {pipeline_mode = #tpu.pipeline_mode<synchronous>, transform_indices = @transform_3, window_bounds = array<i64: 128, 128>}, {pipeline_mode = #tpu.pipeline_mode<synchronous>, transform_indices = @transform_4, window_bounds = array<i64: 1, 128>}, {transform_indices = @transform_5, window_bounds = array<i64: 8, 128>}]} {
    %c0 = arith.constant 0 : index
    %c0_0 = arith.constant 0 : index
    %0 = vector.load %arg1[%c0, %c0_0] : memref<8x32xf32, #tpu.memory_space<vmem>>, vector<8x32xf32>
    %c0_1 = arith.constant 0 : index
    %c0_2 = arith.constant 0 : index
    %1 = vector.load %arg2[%c0_1, %c0_2] : memref<32x128xf32, #tpu.memory_space<vmem>>, vector<32x128xf32>
    %cst = arith.constant dense<0.000000e+00> : vector<8x128xf32>
    %2 = tpu.matmul %0, %1, %cst {dimension_numbers = #tpu.dot_dimension_numbers<[1], [0], [0], [1], [0, 0, 1, 1], [], []>} : vector<8x32xf32>, vector<32x128xf32>, vector<8x128xf32> -> vector<8x128xf32>
    %c0_3 = arith.constant 0 : index
    %c0_4 = arith.constant 0 : index
    %3 = vector.load %arg3[%c0_3, %c0_4] : memref<1x128xf32, #tpu.memory_space<vmem>>, vector<1x128xf32>
    %4 = vector.broadcast %3 : vector<1x128xf32> to vector<8x128xf32>
    %5 = arith.addf %2, %4 : vector<8x128xf32>
    %cst_5 = arith.constant 0.000000e+00 : f32
    %6 = vector.broadcast %cst_5 : f32 to vector<8x128xf32>
    %7 = arith.maximumf %5, %6 : vector<8x128xf32>
    %c0_6 = arith.constant 0 : index
    %c0_7 = arith.constant 0 : index
    %8 = vector.load %arg4[%c0_6, %c0_7] : memref<128x128xf32, #tpu.memory_space<vmem>>, vector<128x128xf32>
    %cst_8 = arith.constant dense<0.000000e+00> : vector<8x128xf32>
    %9 = tpu.matmul %7, %8, %cst_8 {dimension_numbers = #tpu.dot_dimension_numbers<[1], [0], [0], [1], [0, 0, 1, 1], [], []>} : vector<8x128xf32>, vector<128x128xf32>, vector<8x128xf32> -> vector<8x128xf32>
    %c0_9 = arith.constant 0 : index
    %c0_10 = arith.constant 0 : index
    %10 = vector.load %arg5[%c0_9, %c0_10] : memref<1x128xf32, #tpu.memory_space<vmem>>, vector<1x128xf32>
    %11 = vector.broadcast %10 : vector<1x128xf32> to vector<8x128xf32>
    %12 = arith.addf %9, %11 : vector<8x128xf32>
    %c0_11 = arith.constant 0 : index
    %c0_12 = arith.constant 0 : index
    %13 = vector.load %arg6[%c0_11, %c0_12] : memref<8x128xf32, #tpu.memory_space<vmem>>, vector<8x128xf32>
    tpu.vector_store %arg6[%c0_11, %c0_12], %12 {strides = array<i32>} : memref<8x128xf32, #tpu.memory_space<vmem>>, vector<8x128xf32>,
    return
  }
  func.func @transform_0(%arg0: i32) -> (i32, i32) {
    %c0_i32 = arith.constant 0 : i32
    %c0_i32_0 = arith.constant 0 : i32
    return %arg0, %c0_i32 : i32, i32
  }
  func.func @transform_1(%arg0: i32) -> (i32, i32) {
    %c0_i32 = arith.constant 0 : i32
    %c0_i32_0 = arith.constant 0 : i32
    %c0_i32_1 = arith.constant 0 : i32
    return %c0_i32, %c0_i32_0 : i32, i32
  }
  func.func @transform_2(%arg0: i32) -> (i32, i32) {
    %c0_i32 = arith.constant 0 : i32
    %c0_i32_0 = arith.constant 0 : i32
    %c0_i32_1 = arith.constant 0 : i32
    return %c0_i32, %c0_i32_0 : i32, i32
  }
  func.func @transform_3(%arg0: i32) -> (i32, i32) {
    %c0_i32 = arith.constant 0 : i32
    %c0_i32_0 = arith.constant 0 : i32
    %c0_i32_1 = arith.constant 0 : i32
    return %c0_i32, %c0_i32_0 : i32, i32
  }
  func.func @transform_4(%arg0: i32) -> (i32, i32) {
    %c0_i32 = arith.constant 0 : i32
    %c0_i32_0 = arith.constant 0 : i32
    %c0_i32_1 = arith.constant 0 : i32
    return %c0_i32, %c0_i32_0 : i32, i32
  }
  func.func @transform_5(%arg0: i32) -> (i32, i32) {
    %c0_i32 = arith.constant 0 : i32
    %c0_i32_0 = arith.constant 0 : i32
    return %arg0, %c0_i32 : i32, i32
  }
}

module attributes {stable_mosaic.version = 11 : i64} {
  func.func @_fused_heads_kernel(%arg0: i32, %arg1: memref<8x32xf32, #tpu.memory_space<vmem>>, %arg2: memref<32x128xf32, #tpu.memory_space<vmem>>, %arg3: memref<1x128xf32, #tpu.memory_space<vmem>>, %arg4: memref<128x128xf32, #tpu.memory_space<vmem>>, %arg5: memref<1x128xf32, #tpu.memory_space<vmem>>, %arg6: memref<8x128xf32, #tpu.memory_space<vmem>>) attributes {dimension_semantics = [#tpu.dimension_semantics<parallel>], iteration_bounds = array<i64: 1>, scalar_prefetch = 0 : i64, scratch_operands = 0 : i64, tpu.core_type = #tpu.core_type<tc>, window_params = [{transform_indices = @transform_0, window_bounds = array<i64: 8, 32>}, {pipeline_mode = #tpu.pipeline_mode<synchronous>, transform_indices = @transform_1, window_bounds = array<i64: 32, 128>}, {pipeline_mode = #tpu.pipeline_mode<synchronous>, transform_indices = @transform_2, window_bounds = array<i64: 1, 128>}, {pipeline_mode = #tpu.pipeline_mode<synchronous>, transform_indices = @transform_3, window_bounds = array<i64: 128, 128>}, {pipeline_mode = #tpu.pipeline_mode<synchronous>, transform_indices = @transform_4, window_bounds = array<i64: 1, 128>}, {transform_indices = @transform_5, window_bounds = array<i64: 8, 128>}]} {
    %c0 = arith.constant 0 : index
    %c0_0 = arith.constant 0 : index
    %0 = vector.load %arg1[%c0, %c0_0] : memref<8x32xf32, #tpu.memory_space<vmem>>, vector<8x32xf32>
    %c0_1 = arith.constant 0 : index
    %c0_2 = arith.constant 0 : index
    %1 = vector.load %arg2[%c0_1, %c0_2] : memref<32x128xf32, #tpu.memory_space<vmem>>, vector<32x128xf32>
    %cst = arith.constant dense<0.000000e+00> : vector<8x128xf32>
    %2 = tpu.matmul %0, %1, %cst {dimension_numbers = #tpu.dot_dimension_numbers<[1], [0], [0], [1], [0, 0, 1, 1], [], []>} : vector<8x32xf32>, vector<32x128xf32>, vector<8x128xf32> -> vector<8x128xf32>
    %c0_3 = arith.constant 0 : index
    %c0_4 = arith.constant 0 : index
    %3 = vector.load %arg3[%c0_3, %c0_4] : memref<1x128xf32, #tpu.memory_space<vmem>>, vector<1x128xf32>
    %4 = vector.broadcast %3 : vector<1x128xf32> to vector<8x128xf32>
    %5 = arith.addf %2, %4 : vector<8x128xf32>
    %cst_5 = arith.constant 0.000000e+00 : f32
    %6 = vector.broadcast %cst_5 : f32 to vector<8x128xf32>
    %7 = arith.maximumf %5, %6 : vector<8x128xf32>
    %c0_6 = arith.constant 0 : index
    %c0_7 = arith.constant 0 : index
    %8 = vector.load %arg4[%c0_6, %c0_7] : memref<128x128xf32, #tpu.memory_space<vmem>>, vector<128x128xf32>
    %cst_8 = arith.constant dense<0.000000e+00> : vector<8x128xf32>
    %9 = tpu.matmul %7, %8, %cst_8 {dimension_numbers = #tpu.dot_dimension_numbers<[1], [0], [0], [1], [0, 0, 1, 1], [], []>} : vector<8x128xf32>, vector<128x128xf32>, vector<8x128xf32> -> vector<8x128xf32>
    %c0_9 = arith.constant 0 : index
    %c0_10 = arith.constant 0 : index
    %10 = vector.load %arg5[%c0_9, %c0_10] : memref<1x128xf32, #tpu.memory_space<vmem>>, vector<1x128xf32>
    %11 = vector.broadcast %10 : vector<1x128xf32> to vector<8x128xf32>
    %12 = arith.addf %9, %11 : vector<8x128xf32>
    %c0_11 = arith.constant 0 : index
    %c0_12 = arith.constant 0 : index
    %13 = vector.load %arg6[%c0_11, %c0_12] : memref<8x128xf32, #tpu.memory_space<vmem>>, vector<8x128xf32>
    tpu.vector_store %arg6[%c0_11, %c0_12], %12 {strides = array<i32>} : memref<8x128xf32, #tpu.memory_space<vmem>>, vector<8x128xf32>,
    return
  }
  func.func @transform_0(%arg0: i32) -> (i32, i32) {
    %c0_i32 = arith.constant 0 : i32
    %c0_i32_0 = arith.constant 0 : i32
    return %arg0, %c0_i32 : i32, i32
  }
  func.func @transform_1(%arg0: i32) -> (i32, i32) {
    %c0_i32 = arith.constant 0 : i32
    %c0_i32_0 = arith.constant 0 : i32
    %c0_i32_1 = arith.constant 0 : i32
    return %c0_i32, %c0_i32_0 : i32, i32
  }
  func.func @transform_2(%arg0: i32) -> (i32, i32) {
    %c0_i32 = arith.constant 0 : i32
    %c0_i32_0 = arith.constant 0 : i32
    %c0_i32_1 = arith.constant 0 : i32
    return %c0_i32, %c0_i32_0 : i32, i32
  }
  func.func @transform_3(%arg0: i32) -> (i32, i32) {
    %c0_i32 = arith.constant 0 : i32
    %c0_i32_0 = arith.constant 0 : i32
    %c0_i32_1 = arith.constant 0 : i32
    return %c0_i32, %c0_i32_0 : i32, i32
  }
  func.func @transform_4(%arg0: i32) -> (i32, i32) {
    %c0_i32 = arith.constant 0 : i32
    %c0_i32_0 = arith.constant 0 : i32
    %c0_i32_1 = arith.constant 0 : i32
    return %c0_i32, %c0_i32_0 : i32, i32
  }
  func.func @transform_5(%arg0: i32) -> (i32, i32) {
    %c0_i32 = arith.constant 0 : i32
    %c0_i32_0 = arith.constant 0 : i32
    return %arg0, %c0_i32 : i32, i32
  }
}

</mosaic_0001>

<bundles_post_ra>
// kernel: tpu_custom_call.1
= control target key start
LH: loop header
LB: loop body
LE: loop exit
PB: predicated region body
PF: predicated region fallthrough
CT: control target
= control target key end

     0   :  { %10 = vsyncpa [#allocation3], 0  ;;  %s338_s0 = inlined_call_operand.hbm [shape: f32[2,32], index: 0, kind: input, shape index: {}]   ;;  %s339_s1 = inlined_call_operand.hbm [shape: f32[32,128], index: 1, kind: input, shape index: {}]   ;;  %s340_s2 = inlined_call_operand.vmem [shape: f32[1,128], index: 2, kind: input, shape index: {}]   ;;  %s341_s3 = inlined_call_operand.hbm [shape: f32[128,128], index: 3, kind: input, shape index: {}]   ;;  %s342_s4 = inlined_call_operand.vmem [shape: f32[1,128], index: 4, kind: input, shape index: {}]   ;;  %s343_s5 = inlined_call_operand.hbm [shape: f32[2,128], index: 5, kind: output, shape index: {}]  }
   0x1   :  { %11 = vsyncpa [#allocation6], 0 }
   0x2   :  { %12 = vsyncpa [#allocation4], 0  ;;  %s30_s20 = sshll.u32 %s339_s1, 4  ;;  %s31_s20 = int_to_ptr.hbm [resolvable:$true] %s30_s20 }
   0x3   :  { %16 = vsyncadd [#allocation3], 96  ;;  %s276_s21 = smov [#allocation5]   ;;  %s17_s25 = sshll.u32 %s338_s0, 4  ;;  %s18_s25 = int_to_ptr.hbm [resolvable:$true] %s17_s25 }
   0x4   :  { %s32_s22 = sshll.u32 %s276_s21, 4  ;;  %s277_s26 = smov 128   ;;  %s33_s22 = int_to_ptr.vmem [resolvable:$true] %s32_s22 }
   0x5   :  { %s278_s27 = smov 8   ;;  %s279_s28 = smov [#allocation2]  }
   0x6   :  { %38 = dma.hbm_to_vmem [thread:$0]  %s31_s20, 512, %s33_s22, [#allocation6], %s277_s26, %s277_s26, %s278_s27  }
   0x7   :  { %s19_s29 = sshll.u32 %s279_s28, 4  ;;  %s280_s30 = smov 32   ;;  %s20_s29 = int_to_ptr.vmem [resolvable:$true] %s19_s29 }
   0x8   :  { %s281_s6 = smov 2   ;;  %s45_s8 = sshll.u32 %s341_s3, 4  ;;  %s46_s8 = int_to_ptr.hbm [resolvable:$true] %s45_s8 }
   0x9   :  { %25 = dma.hbm_to_vmem [thread:$0]  %s18_s25, 32, %s20_s29, [#allocation3], %s280_s30, %s280_s30, %s281_s6  }
   0xa   :  { %s282_s9 = smov [#allocation7]  }
   0xb   :  { %s47_s0 = sshll.u32 %s282_s9, 4  ;;  %s48_s0 = int_to_ptr.vmem [resolvable:$true] %s47_s0 }
   0xc   :  { %53 = dma.hbm_to_vmem [thread:$0]  %s46_s8, 2048, %s48_s0, [#allocation6], %s277_s26, %s277_s26, %s278_s27  }
   0xd   :  { %270 = dma.done.wait [#allocation3], 128  }
   0xe   :  { %271 = vsyncadd [#allocation3], 4294967168 }
   0xf   :  { %272 = dma.done.wait [#allocation6], 2560  }
  0x10   :  { %273 = vsyncadd [#allocation6], 4294964736  ;;  %v72_v0 = vld [vmem:[#allocation5 + $0x18] sm:$0xff]  ;;  %v71_v1 = vld [vmem:[#allocation5 + $0x10] sm:$0xff]  ;;  %vm77_vm0 = vcmask 261120  }
  0x11   :  { %93 = vmatpush.msra.mxu0 %v72_v0  ;;  %v117_v2 = vld [vmem:[#allocation7 + $0x78] sm:$0xff]  ;;  %v70_v3 = vld [vmem:[#allocation5 + $0x8] sm:$0xff]  ;;  %v116_v4 = vld [vmem:[#allocation7 + $0x70] sm:$0xff] }
  0x12   :  { %122 = vmatpush.msra.mxu1 %v117_v2  ;;  %v115_v5 = vld [vmem:[#allocation7 + $0x68] sm:$0xff]  ;;  %v69_v6 = vld [vmem:[#allocation5] sm:$0xff]  ;;  %v68_v7 = vld [vmem:[#allocation2] sm:$0xff] }
  0x13   :  { %94 = vmatpush.msra.mxu0 %v71_v1  ;;  %v114_v8 = vld [vmem:[#allocation7 + $0x60] sm:$0xff]  ;;  %v113_v9 = vld [vmem:[#allocation7 + $0x58] sm:$0xff]  ;;  %v112_v10 = vld [vmem:[#allocation7 + $0x50] sm:$0xff] }
  0x14   :  { %123 = vmatpush.msra.mxu1 %v116_v4  ;;  %v111_v11 = vld [vmem:[#allocation7 + $0x48] sm:$0xff]  ;;  %v110_v12 = vld [vmem:[#allocation7 + $0x40] sm:$0xff]  ;;  %v109_v13 = vld [vmem:[#allocation7 + $0x38] sm:$0xff] }
  0x15   :  { %95 = vmatpush.msra.mxu0 %v70_v3  ;;  %v108_v14 = vld [vmem:[#allocation7 + $0x30] sm:$0xff]  ;;  %v107_v15 = vld [vmem:[#allocation7 + $0x28] sm:$0xff]  ;;  %v106_v16 = vld [vmem:[#allocation7 + $0x20] sm:$0xff] }
  0x16   :  { %124 = vmatpush.msra.mxu1 %v115_v5  ;;  %v105_v17 = vld [vmem:[#allocation7 + $0x18] sm:$0xff]  ;;  %v104_v18 = vld [vmem:[#allocation7 + $0x10] sm:$0xff]  ;;  %v103_v19 = vld [vmem:[#allocation7 + $0x8] sm:$0xff] }
  0x17   :  { %96 = vmatpush.msra.mxu0 %v69_v6  ;;  %v102_v20 = vld [vmem:[#allocation7] sm:$0xff]  ;;  %v172_v21 = vld [vmem:[%s340_s2] ss:$0 sm:$0xff] }
  0x18   :  { %163 = vmatmul.msk.f32.vlgmr.msra.gmra.mxu0 %vm77_vm0, %v68_v7  ;;  %125 = vmatpush.msra.mxu1 %v114_v8  ;;  %v173_v25 = vld [vmem:[%s342_s4] ss:$0 sm:$0xff] }
  0x1a   :  { %126 = vmatpush.msra.mxu1 %v113_v9 }
  0x1c   :  { %127 = vmatpush.msra.mxu1 %v112_v10 }
  0x1e   :  { %128 = vmatpush.msra.mxu1 %v111_v11 }
  0x20   :  { %129 = vmatpush.msra.mxu1 %v110_v12 }
  0x22   :  { %130 = vmatpush.msra.mxu1 %v109_v13 }
  0x24   :  { %131 = vmatpush.msra.mxu1 %v108_v14 }
  0x26   :  { %132 = vmatpush.msra.mxu1 %v107_v15 }
  0x28   :  { %133 = vmatpush.msra.mxu1 %v106_v16 }
  0x2a   :  { %134 = vmatpush.msra.mxu1 %v105_v17 }
  0x2c   :  { %135 = vmatpush.msra.mxu1 %v104_v18 }
  0x2e   :  { %136 = vmatpush.msra.mxu1 %v103_v19 }
  0x30   :  { %137 = vmatpush.msra.mxu1 %v102_v20 }
  0x95   :  { %v98_v22 = vpop.f32.mrf.mxu0 }
  0x96   :  { %v99_v23 = vadd.f32 %v172_v21, %v98_v22 }
  0x98   :  { %v101_v24 = vmax.f32 %v99_v23, 0.0 }
  0x9a   :  { %138 = vmatmul.f32.vlgmr.msra.gmra.mxu1 %v101_v24 }
 0x117   :  { %v139_v26 = vpop.f32.mrf.mxu1 }
 0x118   :  { %v140_v27 = vadd.f32 %v173_v25, %v139_v26 }
 0x11a   :  { %142 = vst [vmem:[#allocation8] sm:$0xff] %v140_v27 }
 0x11b   :  { %146 = vsyncadd [#allocation4], 96  ;;  %s149_s15 = sshll.u32 %s343_s5, 4  ;;  %s283_s16 = smov [#allocation8]   ;;  %s150_s15 = int_to_ptr.hbm [resolvable:$true] %s149_s15 }
 0x11c   :  { %s147_s17 = sshll.u32 %s283_s16, 4  ;;  %s148_s17 = int_to_ptr.vmem [resolvable:$true] %s147_s17 }
 0x11d   :  { %155 = dma.vmem_to_hbm [thread:$0]  %s148_s17, 32, %s150_s15, [#allocation4], %s280_s30, %s280_s30, %s281_s6  }
 0x11e   :  { %274 = dma.done.wait [#allocation4], 128  }
 0x11f   :  { %275 = vsyncadd [#allocation4], 4294967168 }
 0x120   :  { %160 = vsyncpa [#allocation3], 1 }
 0x121   :  { %161 = vsyncpa [#allocation6], 1 }
 0x122   :  { %162 = vsyncpa [#allocation4], 1 }

// kernel: tpu_custom_call.1
= control target key start
LH: loop header
LB: loop body
LE: loop exit
PB: predicated region body
PF: predicated region fallthrough
CT: control target
= control target key end

     0   :  { %10 = vsyncpa [#allocation3], 0  ;;  %s338_s0 = inlined_call_operand.hbm [shape: f32[2,32], index: 0, kind: input, shape index: {}]   ;;  %s339_s1 = inlined_call_operand.hbm [shape: f32[32,128], index: 1, kind: input, shape index: {}]   ;;  %s340_s2 = inlined_call_operand.vmem [shape: f32[1,128], index: 2, kind: input, shape index: {}]   ;;  %s341_s3 = inlined_call_operand.hbm [shape: f32[128,128], index: 3, kind: input, shape index: {}]   ;;  %s342_s4 = inlined_call_operand.vmem [shape: f32[1,128], index: 4, kind: input, shape index: {}]   ;;  %s343_s5 = inlined_call_operand.hbm [shape: f32[2,128], index: 5, kind: output, shape index: {}]  }
   0x1   :  { %11 = vsyncpa [#allocation6], 0 }
   0x2   :  { %12 = vsyncpa [#allocation4], 0  ;;  %s30_s20 = sshll.u32 %s339_s1, 4  ;;  %s31_s20 = int_to_ptr.hbm [resolvable:$true] %s30_s20 }
   0x3   :  { %16 = vsyncadd [#allocation3], 96  ;;  %s276_s21 = smov [#allocation5]   ;;  %s17_s25 = sshll.u32 %s338_s0, 4  ;;  %s18_s25 = int_to_ptr.hbm [resolvable:$true] %s17_s25 }
   0x4   :  { %s32_s22 = sshll.u32 %s276_s21, 4  ;;  %s277_s26 = smov 128   ;;  %s33_s22 = int_to_ptr.vmem [resolvable:$true] %s32_s22 }
   0x5   :  { %s278_s27 = smov 8   ;;  %s279_s28 = smov [#allocation2]  }
   0x6   :  { %38 = dma.hbm_to_vmem [thread:$0]  %s31_s20, 512, %s33_s22, [#allocation6], %s277_s26, %s277_s26, %s278_s27  }
   0x7   :  { %s19_s29 = sshll.u32 %s279_s28, 4  ;;  %s280_s30 = smov 32   ;;  %s20_s29 = int_to_ptr.vmem [resolvable:$true] %s19_s29 }
   0x8   :  { %s281_s6 = smov 2   ;;  %s45_s8 = sshll.u32 %s341_s3, 4  ;;  %s46_s8 = int_to_ptr.hbm [resolvable:$true] %s45_s8 }
   0x9   :  { %25 = dma.hbm_to_vmem [thread:$0]  %s18_s25, 32, %s20_s29, [#allocation3], %s280_s30, %s280_s30, %s281_s6  }
   0xa   :  { %s282_s9 = smov [#allocation7]  }
   0xb   :  { %s47_s0 = sshll.u32 %s282_s9, 4  ;;  %s48_s0 = int_to_ptr.vmem [resolvable:$true] %s47_s0 }
   0xc   :  { %53 = dma.hbm_to_vmem [thread:$0]  %s46_s8, 2048, %s48_s0, [#allocation6], %s277_s26, %s277_s26, %s278_s27  }
   0xd   :  { %270 = dma.done.wait [#allocation3], 128  }
   0xe   :  { %271 = vsyncadd [#allocation3], 4294967168 }
   0xf   :  { %272 = dma.done.wait [#allocation6], 2560  }
  0x10   :  { %273 = vsyncadd [#allocation6], 4294964736  ;;  %v72_v0 = vld [vmem:[#allocation5 + $0x18] sm:$0xff]  ;;  %v71_v1 = vld [vmem:[#allocation5 + $0x10] sm:$0xff]  ;;  %vm77_vm0 = vcmask 261120  }
  0x11   :  { %93 = vmatpush.msra.mxu0 %v72_v0  ;;  %v117_v2 = vld [vmem:[#allocation7 + $0x78] sm:$0xff]  ;;  %v70_v3 = vld [vmem:[#allocation5 + $0x8] sm:$0xff]  ;;  %v116_v4 = vld [vmem:[#allocation7 + $0x70] sm:$0xff] }
  0x12   :  { %122 = vmatpush.msra.mxu1 %v117_v2  ;;  %v115_v5 = vld [vmem:[#allocation7 + $0x68] sm:$0xff]  ;;  %v69_v6 = vld [vmem:[#allocation5] sm:$0xff]  ;;  %v68_v7 = vld [vmem:[#allocation2] sm:$0xff] }
  0x13   :  { %94 = vmatpush.msra.mxu0 %v71_v1  ;;  %v114_v8 = vld [vmem:[#allocation7 + $0x60] sm:$0xff]  ;;  %v113_v9 = vld [vmem:[#allocation7 + $0x58] sm:$0xff]  ;;  %v112_v10 = vld [vmem:[#allocation7 + $0x50] sm:$0xff] }
  0x14   :  { %123 = vmatpush.msra.mxu1 %v116_v4  ;;  %v111_v11 = vld [vmem:[#allocation7 + $0x48] sm:$0xff]  ;;  %v110_v12 = vld [vmem:[#allocation7 + $0x40] sm:$0xff]  ;;  %v109_v13 = vld [vmem:[#allocation7 + $0x38] sm:$0xff] }
  0x15   :  { %95 = vmatpush.msra.mxu0 %v70_v3  ;;  %v108_v14 = vld [vmem:[#allocation7 + $0x30] sm:$0xff]  ;;  %v107_v15 = vld [vmem:[#allocation7 + $0x28] sm:$0xff]  ;;  %v106_v16 = vld [vmem:[#allocation7 + $0x20] sm:$0xff] }
  0x16   :  { %124 = vmatpush.msra.mxu1 %v115_v5  ;;  %v105_v17 = vld [vmem:[#allocation7 + $0x18] sm:$0xff]  ;;  %v104_v18 = vld [vmem:[#allocation7 + $0x10] sm:$0xff]  ;;  %v103_v19 = vld [vmem:[#allocation7 + $0x8] sm:$0xff] }
  0x17   :  { %96 = vmatpush.msra.mxu0 %v69_v6  ;;  %v102_v20 = vld [vmem:[#allocation7] sm:$0xff]  ;;  %v172_v21 = vld [vmem:[%s340_s2] ss:$0 sm:$0xff] }
  0x18   :  { %163 = vmatmul.msk.f32.vlgmr.msra.gmra.mxu0 %vm77_vm0, %v68_v7  ;;  %125 = vmatpush.msra.mxu1 %v114_v8  ;;  %v173_v25 = vld [vmem:[%s342_s4] ss:$0 sm:$0xff] }
  0x1a   :  { %126 = vmatpush.msra.mxu1 %v113_v9 }
  0x1c   :  { %127 = vmatpush.msra.mxu1 %v112_v10 }
  0x1e   :  { %128 = vmatpush.msra.mxu1 %v111_v11 }
  0x20   :  { %129 = vmatpush.msra.mxu1 %v110_v12 }
  0x22   :  { %130 = vmatpush.msra.mxu1 %v109_v13 }
  0x24   :  { %131 = vmatpush.msra.mxu1 %v108_v14 }
  0x26   :  { %132 = vmatpush.msra.mxu1 %v107_v15 }
  0x28   :  { %133 = vmatpush.msra.mxu1 %v106_v16 }
  0x2a   :  { %134 = vmatpush.msra.mxu1 %v105_v17 }
  0x2c   :  { %135 = vmatpush.msra.mxu1 %v104_v18 }
  0x2e   :  { %136 = vmatpush.msra.mxu1 %v103_v19 }
  0x30   :  { %137 = vmatpush.msra.mxu1 %v102_v20 }
  0x95   :  { %v98_v22 = vpop.f32.mrf.mxu0 }
  0x96   :  { %v99_v23 = vadd.f32 %v172_v21, %v98_v22 }
  0x98   :  { %v101_v24 = vmax.f32 %v99_v23, 0.0 }
  0x9a   :  { %138 = vmatmul.f32.vlgmr.msra.gmra.mxu1 %v101_v24 }
 0x117   :  { %v139_v26 = vpop.f32.mrf.mxu1 }
 0x118   :  { %v140_v27 = vadd.f32 %v173_v25, %v139_v26 }
 0x11a   :  { %142 = vst [vmem:[#allocation8] sm:$0xff] %v140_v27 }
 0x11b   :  { %146 = vsyncadd [#allocation4], 96  ;;  %s149_s15 = sshll.u32 %s343_s5, 4  ;;  %s283_s16 = smov [#allocation8]   ;;  %s150_s15 = int_to_ptr.hbm [resolvable:$true] %s149_s15 }
 0x11c   :  { %s147_s17 = sshll.u32 %s283_s16, 4  ;;  %s148_s17 = int_to_ptr.vmem [resolvable:$true] %s147_s17 }
 0x11d   :  { %155 = dma.vmem_to_hbm [thread:$0]  %s148_s17, 32, %s150_s15, [#allocation4], %s280_s30, %s280_s30, %s281_s6  }
 0x11e   :  { %274 = dma.done.wait [#allocation4], 128  }
 0x11f   :  { %275 = vsyncadd [#allocation4], 4294967168 }
 0x120   :  { %160 = vsyncpa [#allocation3], 1 }
 0x121   :  { %161 = vsyncpa [#allocation6], 1 }
 0x122   :  { %162 = vsyncpa [#allocation4], 1 }

</bundles_post_ra>
